<compile_context>
chip_gen: v7x
topology: tpu7x:2x2x1
jax: 0.10.0
libtpu: 0.0.40
codegen_flags: <defaults>
</compile_context>

<pallas_src>
import jax
import jax.numpy as jnp
import numpy as np
from jax.experimental import pallas as pl
from jax.experimental.pallas import tpu as pltpu


def sap_fc_kernel(x_ref, w_sap_ref, b_sap_ref, ctx_ref, w_fc_t_ref, b_fc_ref,
                  out_ref, pooled_ref):
    # x_ref block: (BB, C, T) in the module's native layout (T on lanes), bf16.
    bb = x_ref.shape[0]

    # Loop-invariant loads hoisted out of the per-sample loop (the fori_loop
    # body is traced once; these are read once per grid step, not per sample).
    w_sap = w_sap_ref[...]      # (C, C) bf16
    b_sap = b_sap_ref[...]      # (C, 1) f32
    ctx = ctx_ref[...]          # (C, 1) f32

    def body(i, carry):
        xb = x_ref[i]                                            # (C, T) bf16

        # h^T = tanh(W_sap @ x_b + b_sap): bf16 MXU matmul, f32 accumulate.
        # The (C,1) bias / ctx broadcasts are implicit in the VPU ops (a
        # pre-materialized (C,T) broadcast would pin C*T f32 live across the
        # whole loop for no gain).
        h = jnp.tanh(
            jnp.dot(w_sap, xb, preferred_element_type=jnp.float32) + b_sap
        )                                                        # (C, T) f32

        # Attention logits, lane-dense (1, T): VPU multiply + sublane (XLU)
        # reduce.  (Switch to a (1,C)@(C,T) MXU dot only if a bundle profile
        # shows VALU saturating in the small-C regime.)
        scores = jnp.sum(h * ctx, axis=0, keepdims=True)         # (1, T) f32

        # Numerically-stable softmax over T; denominator folded into pooling.
        m = jnp.max(scores, axis=-1, keepdims=True)              # (1, 1)
        e = jnp.exp(scores - m)                                  # (1, T)
        denom = jnp.sum(e, axis=-1, keepdims=True)               # (1, 1)

        # Weighted pooling over T directly in (C, T) layout (lane reduce, f32
        # elementwise -- v5e VPU has no bf16), normalized once by 1/denom.
        pooled = jnp.sum(xb.astype(jnp.float32) * e, axis=-1, keepdims=True)
        pooled = pooled * pl.reciprocal(denom, approx=False)     # (C, 1)

        # Store sample i's pooled vector as row i of the (bb, C) scratch.
        # Every grid step writes all bb rows before the FC read below, so the
        # persistent scratch never leaks state across grid steps.
        pooled_ref[pl.ds(i, 1), :] = jnp.transpose(pooled)       # (1, C)
        return carry

    jax.lax.fori_loop(0, bb, body, 0)

    # Batched FC on the whole block: (bb, C) @ (C, E_pad) bf16 MXU matmul with
    # f32 accumulate and a lane-dense (E_pad % 128 == 0) unmasked output store.
    pooled_bc = pooled_ref[...].astype(jnp.bfloat16)             # (bb, C)
    out = jnp.dot(pooled_bc, w_fc_t_ref[...],
                  preferred_element_type=jnp.float32) + b_fc_ref[...]
    out_ref[...] = out.astype(out_ref.dtype)


def _round_up(n, m):
    return ((n + m - 1) // m) * m


def _num_tensorcores_per_chip():
    try:
        return max(1, int(getattr(jax.devices()[0], "num_cores", 1)))
    except Exception:
        return 1


def sap_fc(x_bct, w_sap, b_sap, context_vector, w_fc, b_fc, *, block_b=None):
    """x_bct: (B, C, T) float32. Returns (B, E) float32."""
    B, C, T = x_bct.shape
    E = w_fc.shape[0]

    # ---- dtype: bf16 MXU operands, f32 elementwise math / accumulation ----
    x_bf = x_bct.astype(jnp.bfloat16)
    w_sap_bf = w_sap.astype(jnp.bfloat16)

    # ---- batch blocking ----
    if block_b is None:
        ncores = _num_tensorcores_per_chip()
        # VMEM cap: keep the double-buffered bf16 x block under ~24 MiB so the
        # full working set fits the v7x 64 MiB VMEM (and v5e's small default
        # scoped budget).  Single-TC chips (v5e/v6e) take blocks up to 32 to
        # amortize the ~0.35 us per-step pipeline overhead; multi-TC chips
        # keep >= ncores grid steps so every TensorCore gets work.
        per_sample_bytes = 2 * C * T * 2                 # bf16, double-buffered
        vmem_cap = max(1, (24 << 20) // max(1, per_sample_bytes))
        block_b = max(1, min(32, vmem_cap, pl.cdiv(B, ncores)))
    bb = max(1, min(int(block_b), B))

    b_pad = _round_up(B, bb)
    if b_pad != B:
        # Zero-padded samples produce finite garbage rows that are sliced off.
        x_bf = jnp.pad(x_bf, ((0, b_pad - B), (0, 0), (0, 0)))

    # ---- lane-dense output: pad E to a multiple of 128 (zero cols) ----
    e_pad = _round_up(E, 128)
    w_fc_t = jnp.transpose(w_fc).astype(jnp.bfloat16)   # (C, E) bf16
    b_fc_row = b_fc.reshape(1, E).astype(jnp.float32)
    if e_pad != E:
        w_fc_t = jnp.pad(w_fc_t, ((0, 0), (0, e_pad - E)))
        b_fc_row = jnp.pad(b_fc_row, ((0, 0), (0, e_pad - E)))

    b_sap_col = b_sap.reshape(C, 1).astype(jnp.float32)
    ctx_col = context_vector.reshape(C, 1).astype(jnp.float32)

    grid = (b_pad // bb,)

    # ---- explicit VMEM budget (double-buffered x/out, single-buffered weights) ----
    est = (2 * bb * C * T * 2                    # x block (bf16, 2 buffers)
           + (C * C + C * e_pad) * 2             # W_sap, W_fc^T (bf16, 1 buffer)
           + (2 * C + e_pad) * 4                 # b_sap, ctx, b_fc (f32)
           + 2 * bb * e_pad * 4                  # output block (f32, 2 buffers)
           + bb * C * 4)                         # pooled scratch
    vmem_limit = int(min(max(2 * est + (2 << 20), 4 << 20), 64 << 20))

    resident = dict(pipeline_mode=pl.Buffered(1))   # grid-invariant operands

    out = pl.pallas_call(
        sap_fc_kernel,
        out_shape=jax.ShapeDtypeStruct((b_pad, e_pad), jnp.float32),
        grid_spec=pltpu.PrefetchScalarGridSpec(
            num_scalar_prefetch=0,
            grid=grid,
            in_specs=[
                pl.BlockSpec((bb, C, T), lambda b: (b, 0, 0)),              # x (native B,C,T, bf16)
                pl.BlockSpec((C, C), lambda b: (0, 0), **resident),         # W_sap (bf16)
                pl.BlockSpec((C, 1), lambda b: (0, 0), **resident),         # b_sap (f32 column)
                pl.BlockSpec((C, 1), lambda b: (0, 0), **resident),         # context vector (f32)
                pl.BlockSpec((C, e_pad), lambda b: (0, 0), **resident),     # W_fc^T (bf16, lane-padded)
                pl.BlockSpec((1, e_pad), lambda b: (0, 0), **resident),     # b_fc (f32, lane-padded)
            ],
            out_specs=pl.BlockSpec((bb, e_pad), lambda b: (b, 0)),
            scratch_shapes=[pltpu.VMEM((bb, C), jnp.float32)],              # pooled rows
        ),
        compiler_params=pltpu.CompilerParams(
            dimension_semantics=("parallel",),
            vmem_limit_bytes=vmem_limit),
    )(x_bf, w_sap_bf, b_sap_col, ctx_col, w_fc_t, b_fc_row)

    return out[:B, :E]


def sap_fc_reference(x_bct, w_sap, b_sap, context_vector, w_fc, b_fc):
    """Pure-JAX f32 reference mirroring the PyTorch forward."""
    x = jnp.transpose(x_bct, (0, 2, 1))                          # (B, T, C)
    h = jnp.tanh(jnp.einsum("btc,dc->btd", x, w_sap) + b_sap)    # (B, T, C)
    w = jnp.einsum("btc,cd->btd", h, context_vector)             # (B, T, 1)
    w = jax.nn.softmax(w, axis=1)
    pooled = jnp.sum(x * w, axis=1)                              # (B, C)
    return jnp.einsum("bc,ec->be", pooled, w_fc) + b_fc          # (B, E)


def xavier_normal(key, shape):
    fan_in, fan_out = shape[1], shape[0]
    std = float(np.sqrt(2.0 / (fan_in + fan_out)))
    return jax.random.normal(key, shape, dtype=jnp.float32) * std


if __name__ == "__main__":
    # Small shapes consistent with the module's forward: x (B, C, T).
    B, C, T, E = 2, 4, 16, 32

    key = jax.random.PRNGKey(0)
    k_x, k_wsap, k_bsap, k_ctx, k_wfc, k_bfc = jax.random.split(key, 6)

    x = jax.random.normal(k_x, (B, C, T), dtype=jnp.float32)

    # Deterministic parameter init (xavier-normal weights/context, small
    # uniform biases — synthetic, not a checkpoint load).
    w_sap = xavier_normal(k_wsap, (C, C))                        # Linear(C -> C) weight
    b_sap = jax.random.uniform(k_bsap, (C,), jnp.float32, -0.1, 0.1)
    context_vector = xavier_normal(k_ctx, (C, 1))                # (C, 1)
    w_fc = xavier_normal(k_wfc, (E, C))                          # Linear(C -> E) weight
    b_fc = jax.random.uniform(k_bfc, (E,), jnp.float32, -0.1, 0.1)

    out = sap_fc(x, w_sap, b_sap, context_vector, w_fc, b_fc)
    out = jax.block_until_ready(out)

    ref = sap_fc_reference(x, w_sap, b_sap, context_vector, w_fc, b_fc)
    # bf16 MXU operands (x, W_sap, W_fc^T) => ~1e-2-level agreement vs f32 ref.
    np.testing.assert_allclose(np.asarray(out), np.asarray(ref),
                               rtol=2e-2, atol=2e-2)
    assert out.shape == (B, E)

    print("KERNEL_OK")
</pallas_src>

<mosaic_0001>
module attributes {stable_mosaic.version = 11 : i64} {
  func.func @sap_fc_kernel(%arg0: i32, %arg1: memref<2x4x16xbf16, #tpu.memory_space<vmem>>, %arg2: memref<4x4xbf16, #tpu.memory_space<vmem>>, %arg3: memref<4x1xf32, #tpu.memory_space<vmem>>, %arg4: memref<4x1xf32, #tpu.memory_space<vmem>>, %arg5: memref<4x128xbf16, #tpu.memory_space<vmem>>, %arg6: memref<1x128xf32, #tpu.memory_space<vmem>>, %arg7: memref<2x128xf32, #tpu.memory_space<vmem>>, %arg8: memref<2x4xf32, #tpu.memory_space<vmem>>) attributes {dimension_semantics = [#tpu.dimension_semantics<parallel>], iteration_bounds = array<i64: 1>, scalar_prefetch = 0 : i64, scratch_operands = 1 : i64, tpu.core_type = #tpu.core_type<tc>, window_params = [{transform_indices = @transform_0, window_bounds = array<i64: 2, 4, 16>}, {pipeline_mode = #tpu.pipeline_mode<synchronous>, transform_indices = @transform_1, window_bounds = array<i64: 4, 4>}, {pipeline_mode = #tpu.pipeline_mode<synchronous>, transform_indices = @transform_2, window_bounds = array<i64: 4, 1>}, {pipeline_mode = #tpu.pipeline_mode<synchronous>, transform_indices = @transform_3, window_bounds = array<i64: 4, 1>}, {pipeline_mode = #tpu.pipeline_mode<synchronous>, transform_indices = @transform_4, window_bounds = array<i64: 4, 128>}, {pipeline_mode = #tpu.pipeline_mode<synchronous>, transform_indices = @transform_5, window_bounds = array<i64: 1, 128>}, {transform_indices = @transform_6, window_bounds = array<i64: 2, 128>}]} {
    %c0 = arith.constant 0 : index
    %c0_0 = arith.constant 0 : index
    %0 = vector.load %arg2[%c0, %c0_0] : memref<4x4xbf16, #tpu.memory_space<vmem>>, vector<4x4xbf16>
    %c0_1 = arith.constant 0 : index
    %c0_2 = arith.constant 0 : index
    %1 = vector.load %arg3[%c0_1, %c0_2] : memref<4x1xf32, #tpu.memory_space<vmem>>, vector<4x1xf32>
    %c0_3 = arith.constant 0 : index
    %c0_4 = arith.constant 0 : index
    %2 = vector.load %arg4[%c0_3, %c0_4] : memref<4x1xf32, #tpu.memory_space<vmem>>, vector<4x1xf32>
    %c0_i32 = arith.constant 0 : i32
    %c2_i32 = arith.constant 2 : i32
    %3 = arith.addi %c0_i32, %c2_i32 : i32
    %c1_i32 = arith.constant 1 : i32
    scf.for %arg9 = %c0_i32 to %3 step %c1_i32  : i32 {
      %12 = arith.index_cast %arg9 : i32 to index
      %c0_14 = arith.constant 0 : index
      %c0_15 = arith.constant 0 : index
      %13 = vector.load %arg1[%12, %c0_14, %c0_15] : memref<2x4x16xbf16, #tpu.memory_space<vmem>>, vector<1x4x16xbf16>
      %14 = vector.shape_cast %13 : vector<1x4x16xbf16> to vector<4x16xbf16>
      %cst_16 = arith.constant dense<0.000000e+00> : vector<4x16xf32>
      %15 = tpu.matmul %0, %14, %cst_16 {dimension_numbers = #tpu.dot_dimension_numbers<[1], [0], [0], [1], [0, 0, 1, 1], [], []>} : vector<4x4xbf16>, vector<4x16xbf16>, vector<4x16xf32> -> vector<4x16xf32>
      %16 = vector.broadcast %1 : vector<4x1xf32> to vector<4x16xf32>
      %17 = arith.addf %15, %16 : vector<4x16xf32>
      %18 = math.tanh %17 : vector<4x16xf32>
      %19 = vector.broadcast %2 : vector<4x1xf32> to vector<4x16xf32>
      %20 = arith.mulf %18, %19 : vector<4x16xf32>
      %cst_17 = arith.constant dense<0.000000e+00> : vector<16xf32>
      %21 = vector.multi_reduction <add>, %20, %cst_17 [0] : vector<4x16xf32> to vector<16xf32>
      %22 = vector.shape_cast %21 : vector<16xf32> to vector<1x16xf32>
      %cst_18 = arith.constant dense<0xFF800000> : vector<1xf32>
      %23 = vector.multi_reduction <maximumf>, %22, %cst_18 [1] : vector<1x16xf32> to vector<1xf32>
      %24 = vector.shape_cast %23 : vector<1xf32> to vector<1x1xf32>
      %25 = vector.broadcast %24 : vector<1x1xf32> to vector<1x16xf32>
      %26 = arith.subf %22, %25 : vector<1x16xf32>
      %27 = math.exp %26 : vector<1x16xf32>
      %cst_19 = arith.constant dense<0.000000e+00> : vector<1xf32>
      %28 = vector.multi_reduction <add>, %27, %cst_19 [1] : vector<1x16xf32> to vector<1xf32>
      %29 = vector.shape_cast %28 : vector<1xf32> to vector<1x1xf32>
      %30 = arith.extf %14 : vector<4x16xbf16> to vector<4x16xf32>
      %31 = vector.broadcast %27 : vector<1x16xf32> to vector<4x16xf32>
      %32 = arith.mulf %30, %31 : vector<4x16xf32>
      %cst_20 = arith.constant dense<0.000000e+00> : vector<4xf32>
      %33 = vector.multi_reduction <add>, %32, %cst_20 [1] : vector<4x16xf32> to vector<4xf32>
      %34 = vector.shape_cast %33 : vector<4xf32> to vector<4x1xf32>
      %35 = tpu.reciprocal %29 : vector<1x1xf32> -> vector<1x1xf32>
      %36 = vector.broadcast %35 : vector<1x1xf32> to vector<4x1xf32>
      %37 = arith.mulf %34, %36 : vector<4x1xf32>
      %38 = tpu.transpose %37, [1, 0] : vector<4x1xf32> -> vector<1x4xf32>
      %39 = arith.index_cast %arg9 : i32 to index
      %c0_21 = arith.constant 0 : index
      %40 = vector.load %arg8[%39, %c0_21] : memref<2x4xf32, #tpu.memory_space<vmem>>, vector<1x4xf32>
      tpu.vector_store %arg8[%39, %c0_21], %38 {strides = array<i32>} : memref<2x4xf32, #tpu.memory_space<vmem>>, vector<1x4xf32>,
    }
    %c2_i32_5 = arith.constant 2 : i32
    %c0_6 = arith.constant 0 : index
    %c0_7 = arith.constant 0 : index
    %4 = vector.load %arg8[%c0_6, %c0_7] : memref<2x4xf32, #tpu.memory_space<vmem>>, vector<2x4xf32>
    %5 = arith.truncf %4 : vector<2x4xf32> to vector<2x4xbf16>
    %c0_8 = arith.constant 0 : index
    %c0_9 = arith.constant 0 : index
    %6 = vector.load %arg5[%c0_8, %c0_9] : memref<4x128xbf16, #tpu.memory_space<vmem>>, vector<4x128xbf16>
    %cst = arith.constant dense<0.000000e+00> : vector<2x128xf32>
    %7 = tpu.matmul %5, %6, %cst {dimension_numbers = #tpu.dot_dimension_numbers<[1], [0], [0], [1], [0, 0, 1, 1], [], []>} : vector<2x4xbf16>, vector<4x128xbf16>, vector<2x128xf32> -> vector<2x128xf32>
    %c0_10 = arith.constant 0 : index
    %c0_11 = arith.constant 0 : index
    %8 = vector.load %arg6[%c0_10, %c0_11] : memref<1x128xf32, #tpu.memory_space<vmem>>, vector<1x128xf32>
    %9 = vector.broadcast %8 : vector<1x128xf32> to vector<2x128xf32>
    %10 = arith.addf %7, %9 : vector<2x128xf32>
    %c0_12 = arith.constant 0 : index
    %c0_13 = arith.constant 0 : index
    %11 = vector.load %arg7[%c0_12, %c0_13] : memref<2x128xf32, #tpu.memory_space<vmem>>, vector<2x128xf32>
    tpu.vector_store %arg7[%c0_12, %c0_13], %10 {strides = array<i32>} : memref<2x128xf32, #tpu.memory_space<vmem>>, vector<2x128xf32>,
    return
  }
  func.func @transform_0(%arg0: i32) -> (i32, i32, i32) {
    %c0_i32 = arith.constant 0 : i32
    %c0_i32_0 = arith.constant 0 : i32
    %c0_i32_1 = arith.constant 0 : i32
    return %arg0, %c0_i32, %c0_i32_0 : i32, i32, i32
  }
  func.func @transform_1(%arg0: i32) -> (i32, i32) {
    %c0_i32 = arith.constant 0 : i32
    %c0_i32_0 = arith.constant 0 : i32
    %c0_i32_1 = arith.constant 0 : i32
    return %c0_i32, %c0_i32_0 : i32, i32
  }
  func.func @transform_2(%arg0: i32) -> (i32, i32) {
    %c0_i32 = arith.constant 0 : i32
    %c0_i32_0 = arith.constant 0 : i32
    %c0_i32_1 = arith.constant 0 : i32
    return %c0_i32, %c0_i32_0 : i32, i32
  }
  func.func @transform_3(%arg0: i32) -> (i32, i32) {
    %c0_i32 = arith.constant 0 : i32
    %c0_i32_0 = arith.constant 0 : i32
    %c0_i32_1 = arith.constant 0 : i32
    return %c0_i32, %c0_i32_0 : i32, i32
  }
  func.func @transform_4(%arg0: i32) -> (i32, i32) {
    %c0_i32 = arith.constant 0 : i32
    %c0_i32_0 = arith.constant 0 : i32
    %c0_i32_1 = arith.constant 0 : i32
    return %c0_i32, %c0_i32_0 : i32, i32
  }
  func.func @transform_5(%arg0: i32) -> (i32, i32) {
    %c0_i32 = arith.constant 0 : i32
    %c0_i32_0 = arith.constant 0 : i32
    %c0_i32_1 = arith.constant 0 : i32
    return %c0_i32, %c0_i32_0 : i32, i32
  }
  func.func @transform_6(%arg0: i32) -> (i32, i32) {
    %c0_i32 = arith.constant 0 : i32
    %c0_i32_0 = arith.constant 0 : i32
    return %arg0, %c0_i32 : i32, i32
  }
}

</mosaic_0001>

<bundles_post_ra>
// kernel: tpu_custom_call.1
= control target key start
LH: loop header
LB: loop body
LE: loop exit
PB: predicated region body
PF: predicated region fallthrough
CT: control target
= control target key end

     0   :  { %11 = vsyncpa [#allocation4], 0  ;;  %s367_s27 = smov 0   ;;  %s407_s0 = inlined_call_operand.vmem [shape: bf16[2,4,16], index: 0, kind: input, shape index: {}]   ;;  %s408_s1 = inlined_call_operand.vmem [shape: bf16[4,4], index: 1, kind: input, shape index: {}]   ;;  %s409_s2 = inlined_call_operand.vmem [shape: f32[4,1], index: 2, kind: input, shape index: {}]   ;;  %s410_s3 = inlined_call_operand.vmem [shape: f32[4,1], index: 3, kind: input, shape index: {}]   ;;  %s411_s4 = inlined_call_operand.vmem [shape: bf16[4,128], index: 4, kind: input, shape index: {}]   ;;  %s412_s5 = inlined_call_operand.vmem [shape: f32[1,128], index: 5, kind: input, shape index: {}]   ;;  %s413_s6 = inlined_call_operand.hbm [shape: f32[2,128], index: 6, kind: output, shape index: {}]  }
   0x1   :  { %v355_v0 = vld [vmem:[%s408_s1] sm:$0x3] }
   0x2   :  { %v360_v1 = vld [vmem:[%s409_s2] sm:$0xf] }
   0x3   :  { %v365_v2 = vld [vmem:[%s410_s3] sm:$0xf] }
   0x4 LB: > { %v311_v3 = vmov 0.0   ;;  %vm312_vm0 = vmmov 0   ;;  %s238_s1 = sshll.u32 %s309_s27, 1  ;;  %vm46_vm1 = vcmask 1041408   ;;  %v313_v4 = vmov 0   ;;  %s154_s29 = scalar_lea.vmem [#allocation2], %s309_s27  ;;  %s309_s27 = sphi %s367_s27, %s33_s27  }
   0x5   : > { %246 = vmatprep.subr.bf16.mxu0 %v311_v3  ;;  %248 = vmatprep.mubr.msk.bf16.mxu0 %vm312_vm0, %v311_v3  ;;  %s35_s3 = scalar_lea.vmem %s407_s0, %s238_s1  ;;  %vm42_vm2 = vcmask 31744   ;;  %vm97_vm3 = vcmask 125952   ;;  %vm105_vm4 = vcmask 130048   ;;  %vm155_vm5 = vcmask 24576   ;;  %s33_s27 = sadd.s32 1, %s309_s27  }
   0x6   : > { %272 = vset.pattern.permute.xlu0 %v313_v4  ;;  %v36_v5 = vld [vmem:[%s35_s3] sm:$0x3]  ;;  %p30_p0 = scmp.ge.s32.totalorder %s33_s27, 2  }
   0x7   : > { %39 = vperm.xlu0 %272, %v360_v1   ;;  %v48_v6 = vsel %vm46_vm1, %v36_v5, 0  ;;  %v115_v27 = vunpack.c.l.bf16 %v36_v5  ;;  %v159_v37 = vld [vmem:[%s411_s4] sm:$0x3] (%p30_p0)  ;;  %v314_v39 = vmov (%p30_p0), 0.0   ;;  %vm315_vm6 = vmmov (%p30_p0), 0   ;;  %s316_s10 = smov (%p30_p0), [#allocation3]  }
   0x8   : > { %247 = vmatpush3.bf16.msra.mxu0 %v48_v6  ;;  %v173_v40 = vsel (%p30_p0), %vm46_vm1, %v159_v37, 0  ;;  %v240_v42 = vld [vmem:[%s412_s5] ss:$0 sm:$0xff] (%p30_p0)  ;;  %s222_s0 = sshll.u32 (%p30_p0), %s316_s10, 4  ;;  %s223_s0 = int_to_ptr.vmem [resolvable:$true] %s222_s0 }
   0x9   :  { %252 = vmatprep.subr.bf16.mxu0 (%p30_p0), %v314_v39  ;;  %s279_s4 = scalar_lea.vmem (%p30_p0), %s223_s0, 32  ;;  %p284_p2 = scmp.lt.s32.totalorder (%p30_p0), %s223_s0, %s223_s0 }
   0xa   :  { %p280_p1 = scmp.ne.s32.totalorder (%p30_p0), %s223_s0, %s279_s4  ;;  %p285_p3 = scmp.lt.s32.totalorder (%p30_p0), %s279_s4, %s279_s4 }
   0xb   : > { %93 = vperm.xlu0 %272, %v365_v2   ;;  %249 = vmatmul.mubr.msk.bf16.vlgmr.msra.gmra.mrb[0].mxu0 %vm42_vm2, %v355_v0 }
   0xc   :  { %254 = vmatprep.mubr.msk.bf16.mxu0 (%p30_p0), %vm315_vm6, %v314_v39  ;;  %253 = vmatpush3.bf16.msra.mxu0 (%p30_p0), %v173_v40  ;;  %p286_p4 = por (%p30_p0), %p285_p3, %p284_p2 }
   0xe   :  { %p287_p5 = pnand (%p30_p0), %p286_p4, %p280_p1 }
  0x86   : > { %v40_v7 = vpop.permute.xlu0 %39 }
  0x8a   : > { %v94_v14 = vpop.permute.xlu0 %93 }
  0xde   : > { %v84_v8 = vpop.f32.mrb[0].mxu0 }
  0xdf   : > { %v85_v9 = vadd.f32 %v84_v8, %v40_v7  ;;  %v250_v10 = vpop.f32.mrb[1].mxu0 }
  0xe0   : > { %v87_v11 = vpop.f32.mrb[2].mxu0 }
  0xe1   : > { %273 = vtanh.f32 %v85_v9  ;;  %v251_v12 = vpop.f32.mrb[3].mxu0 }
  0xeb   : > { %v274_v13 = vpop.eup %273 }
  0xec   : > { %v96_v15 = vmul.f32 %v274_v13, %v94_v14 }
  0xee   : > { %v98_v16 = vsel %vm97_vm3, %v96_v15, 0.0 }
  0xef   : > { %v99_v17 = vrot.slane %v98_v16, 4 }
  0xf1   : > { %v100_v18 = vadd.f32 %v99_v17, %v98_v16 }
  0xf3   : > { %v101_v19 = vrot.slane %v100_v18, 2 }
  0xf5   : > { %v102_v20 = vadd.f32 %v101_v19, %v100_v18 }
  0xf7   : > { %v103_v21 = vrot.slane %v102_v20, 1 }
  0xf9   : > { %v104_v22 = vadd.f32 %v103_v21, %v102_v20 }
  0xfb   : > { %v106_v23 = vsel %vm105_vm4, %v104_v22, -inf }
  0xfc   : > { %107 = vmax.xlane.f32.xlu1 %v106_v23 }
 0x189   : > { %v108_v24 = vpop.xlane.xlu1 %107 }
 0x18a   : > { %v109_v25 = vsub.f32 %v104_v22, %v108_v24 }
 0x18c   : > { %v110_v26 = vmul.f32 1.442695, %v109_v25 }
 0x18e   : > { %275 = vpow2.f32 %v110_v26 }
 0x198   : > { %v276_v28 = vpop.eup %275 }
 0x199   : > { %v112_v29 = vsel %vm105_vm4, %v276_v28, 0.0  ;;  %v116_v30 = vmul.f32 %v276_v28, %v115_v27 }
 0x19a   : > { %113 = vadd.xlane.f32.xlu1 %v112_v29 }
 0x19b   : > { %v117_v31 = vsel %vm97_vm3, %v116_v30, 0.0 }
 0x19c   : > { %118 = vadd.xlane.f32.xlu0 %v117_v31 }
 0x227   : > { %v114_v32 = vpop.xlane.xlu1 %113 }
 0x228   : > { %277 = vrcp.f32 %v114_v32 }
 0x229   : > { %v119_v34 = vpop.xlane.xlu0 %118 }
 0x232   : > { %v278_v33 = vpop.eup %277 }
 0x233   : > { %v121_v35 = vmul.f32 %v278_v33, %v119_v34 }
 0x235   : > { %122 = vxpose.xlu1.b32.start.end [1/1] (short) (narrow) %v121_v35, 8 }
 0x2b0   :  { %32 = sbr.rel (!%p30_p0) target bundleno = 4 (0x4), region = 53 }
 0x2b5   : > { %v138_v36 = vpop.trf.xlu1 }
 0x2b6   : > { %156 = vst.msk [vmem:[%s154_s29] sm:$0x1] %vm155_vm5, %v138_v36 }
 0x2bd   :  { %v157_v38 = vld [vmem:[#allocation2] sm:$0x3] }
 0x2be   :  { %v158_v41 = vpack.c.bf16 %v157_v38, %v157_v38 }
 0x2c0   :  { %255 = vmatmul.mubr.msk.bf16.vlgmr.msra.gmra.mrb[0].mxu0 %vm42_vm2, %v158_v41 }
 0x393   :  { %v209_v43 = vpop.f32.mrb[0].mxu0 }
 0x394   :  { %v210_v44 = vadd.f32 %v240_v42, %v209_v43  ;;  %v256_v45 = vpop.f32.mrb[1].mxu0 }
 0x395   :  { %v212_v46 = vpop.f32.mrb[2].mxu0 }
 0x396   :  { %215 = vst [vmem:[#allocation3] sm:$0x3] %v210_v44  ;;  %v257_v47 = vpop.f32.mrb[3].mxu0 }
 0x397   :  { %290 = shalt.err (!%p287_p5)
}
 0x398   :  { %s291_s5 = scalar_lea.hbm %s413_s6, 32 }
 0x399   :  { %p292_p6 = scmp.ne.s32.totalorder %s413_s6, %s291_s5  ;;  %p295_p7 = scmp.lt.u32.totalorder %s291_s5, %s413_s6 }
 0x39b   :  { %p297_p8 = pnand %p295_p7, %p292_p6 }
 0x39d   :  { %300 = shalt.err (!%p297_p8)
}
 0x39e   :  { %225 = dma.vmem_to_hbm [thread:$0]  %s223_s0, 32, %s413_s6, [#allocation4]  }
 0x39f   :  { %305 = dma.done.wait [#allocation4], 32  }
 0x3a0   :  { %306 = vsyncadd [#allocation4], 4294967264 }
 0x3a1   :  { %229 = vsyncpa [#allocation4], 1 }

</bundles_post_ra>
